<compile_context>
chip_gen: v5e
topology: v5e:2x2
jax: 0.10.0
libtpu: 0.0.40
codegen_flags: <defaults>
</compile_context>

<pallas_src>
import jax
import jax.numpy as jnp
from jax.experimental import pallas as pl
from jax.experimental.pallas import tpu as pltpu


# ---------------------------------------------------------------------------
# Config (mirrors the PyTorch module's config dict, small synthetic sizes)
# ---------------------------------------------------------------------------
BATCH = 8
INPUT_SIZE = 16
HIDDEN_SIZE = 32
HIDDEN_LAYERS_NB = 2          # FCNetMultiHead passes hidden_layers_nb - 1 = 1 to FCNet
HEADS_NB = 2
OUTPUT_SIZES = (2, 3)         # one Linear(hidden, out_i) per head
_TOTAL_OUT = sum(OUTPUT_SIZES)                      # 5
HEAD_PAD = max(8, ((_TOTAL_OUT + 7) // 8) * 8)      # 8: narrow, contiguous writeback
assert HEAD_PAD <= HIDDEN_SIZE
# activation_function = relu ; output_function = None (identity)


def _act(x):
    return jnp.maximum(x, 0.0)   # activation_function (ReLU)


def _output_function(x):
    return x                      # default: identity (output_function=None)


# ---------------------------------------------------------------------------
# Pallas kernel: MLP trunk + fused heads, one batch tile per grid step
# ---------------------------------------------------------------------------
def fcnet_multihead_kernel(
    x_ref,                       # (TB, INPUT_SIZE) batch tile, f32
    w_in_ref,                    # (INPUT_SIZE, HIDDEN) bf16
    w_h_ref,                     # (HIDDEN, HIDDEN) bf16   (the single inner hidden layer)
    w_out_ref,                   # (HIDDEN, HIDDEN) bf16   trunk output Linear, followed by act
    w_heads_ref,                 # (HIDDEN, HEAD_PAD) bf16 fused + zero-padded head weights
    b_all_ref,                   # (4, HIDDEN) f32 packed biases [in, hidden, out, heads(padded)]
    out_ref,                     # (TB, HEAD_PAD) f32 combined head output
):
    # trunk: input layer + activation (bf16 MXU operands, f32 accumulate/elementwise)
    h = jnp.dot(x_ref[...].astype(jnp.bfloat16), w_in_ref[...],
                preferred_element_type=jnp.float32) + b_all_ref[0:1, :]
    h = _act(h)

    # trunk: hidden layer + activation  (hidden_layers_nb - 1 = 1 layer)
    h = jnp.dot(h.astype(jnp.bfloat16), w_h_ref[...],
                preferred_element_type=jnp.float32) + b_all_ref[1:2, :]
    h = _act(h)

    # trunk: output layer; FCNet's output_function here == activation_function
    h = jnp.dot(h.astype(jnp.bfloat16), w_out_ref[...],
                preferred_element_type=jnp.float32) + b_all_ref[2:3, :]
    h = _act(h)

    # fused heads (output_function is identity by default): one MXU op, one
    # narrow contiguous store for both heads.
    y = jnp.dot(h.astype(jnp.bfloat16), w_heads_ref[...],
                preferred_element_type=jnp.float32) + b_all_ref[3:4, 0:HEAD_PAD]
    out_ref[...] = _output_function(y)


# ---------------------------------------------------------------------------
# One-time parameter packing (hoisted out of the forward hot path)
# ---------------------------------------------------------------------------
def prepare_params(raw_params):
    """Fuse+pad head weights, pack biases, pre-cast MXU weights to bf16."""
    (w_in, b_in, w_h, b_h, w_out, b_out, head_ws, head_bs) = raw_params

    w_heads = jnp.concatenate(head_ws, axis=1)                       # (H, 5)
    b_heads = jnp.concatenate(head_bs, axis=1)                       # (1, 5)
    w_heads = jnp.pad(w_heads, ((0, 0), (0, HEAD_PAD - _TOTAL_OUT)))  # (H, 8)
    b_heads = jnp.pad(b_heads, ((0, 0), (0, HIDDEN_SIZE - _TOTAL_OUT)))  # (1, H)

    b_all = jnp.concatenate([b_in, b_h, b_out, b_heads], axis=0).astype(jnp.float32)

    bf16 = lambda w: w.astype(jnp.bfloat16)
    return (bf16(w_in), bf16(w_h), bf16(w_out), bf16(w_heads), b_all)


# ---------------------------------------------------------------------------
# Forward wrapper: grid over batch, slice per-head outputs
# ---------------------------------------------------------------------------
def fcnet_multihead(x, packed_params, *, block_batch=2048):
    w_in, w_h, w_out, w_heads, b_all = packed_params
    B, F = x.shape

    # --- batch tile: big blocks (overhead/HBM-bound), but keep >=2 blocks so
    #     v7x's two TensorCores both get work on the "parallel" axis ---
    tb = min(block_batch, B)
    if B > 8:
        tb = min(tb, pl.cdiv(B, 2))
    tb = max(8, ((tb + 7) // 8) * 8)          # sublane-aligned
    b_padded = pl.cdiv(B, tb) * tb
    # TODO(synk): for ragged B % tb != 0, jnp.pad copies all of x; handle the
    # tail with a small second pallas_call if that ever shows up in profiles.
    x_in = x if b_padded == B else jnp.pad(x, ((0, b_padded - B), (0, 0)))
    grid = (b_padded // tb,)

    def weight_spec(a):
        # full array, VMEM-resident across all grid steps (index_map ignores i)
        return pl.BlockSpec(a.shape, lambda i: (0, 0))

    # v5e's scoped-VMEM default is 16 MiB; raise it only if this tile needs it.
    vmem_est = 4 * tb * 128 * 4 + (2 << 20)   # double-buffered lane-padded in/out + params/margin
    vmem_limit = vmem_est if vmem_est > (12 << 20) else None

    out = pl.pallas_call(
        fcnet_multihead_kernel,
        out_shape=jax.ShapeDtypeStruct((b_padded, HEAD_PAD), jnp.float32),
        grid=grid,
        in_specs=[
            pl.BlockSpec((tb, F), lambda i: (i, 0)),
            weight_spec(w_in), weight_spec(w_h), weight_spec(w_out),
            weight_spec(w_heads), weight_spec(b_all),
        ],
        out_specs=pl.BlockSpec((tb, HEAD_PAD), lambda i: (i, 0)),
        compiler_params=pltpu.CompilerParams(
            dimension_semantics=("parallel",),
            vmem_limit_bytes=vmem_limit,
        ),
    )(x_in, w_in, w_h, w_out, w_heads, b_all)

    # recover per-head outputs by slicing the narrow combined output
    out = out[:B]
    outs, off = [], 0
    for osz in OUTPUT_SIZES:
        outs.append(out[:, off:off + osz])
        off += osz
    return outs


# ---------------------------------------------------------------------------
# Deterministic parameter init (synthetic; mimics nn.Linear's uniform init)
# ---------------------------------------------------------------------------
def init_params(key):
    def linear(key, fan_in, fan_out):
        k_w, k_b = jax.random.split(key)
        bound = 1.0 / jnp.sqrt(fan_in)
        w = jax.random.uniform(k_w, (fan_in, fan_out), jnp.float32, -bound, bound)
        b = jax.random.uniform(k_b, (1, fan_out), jnp.float32, -bound, bound)
        return w, b

    keys = jax.random.split(key, 3 + HEADS_NB)
    w_in, b_in = linear(keys[0], INPUT_SIZE, HIDDEN_SIZE)
    w_h, b_h = linear(keys[1], HIDDEN_SIZE, HIDDEN_SIZE)
    w_out, b_out = linear(keys[2], HIDDEN_SIZE, HIDDEN_SIZE)
    head_ws, head_bs = [], []
    for i, osz in enumerate(OUTPUT_SIZES):
        w, b = linear(keys[3 + i], HIDDEN_SIZE, osz)
        head_ws.append(w)
        head_bs.append(b)
    return (w_in, b_in, w_h, b_h, w_out, b_out, tuple(head_ws), tuple(head_bs))


# Pure-JAX f32 reference for a sanity check
def reference(x, raw_params):
    (w_in, b_in, w_h, b_h, w_out, b_out, head_ws, head_bs) = raw_params
    h = _act(x @ w_in + b_in)
    h = _act(h @ w_h + b_h)
    h = _act(h @ w_out + b_out)
    return [_output_function(h @ w + b) for w, b in zip(head_ws, head_bs)]


if __name__ == "__main__":
    key = jax.random.PRNGKey(0)
    k_x, k_p = jax.random.split(key)
    raw_params = init_params(k_p)
    packed_params = prepare_params(raw_params)   # fused/padded/bf16 once, not per call

    # tolerance is loose because MXU operands are bf16 (f32 accumulation)
    ATOL = RTOL = 5e-2

    # small case consistent with the module (grid of 1 step)
    x_small = jax.random.normal(k_x, (BATCH, INPUT_SIZE), dtype=jnp.float32)
    outs = fcnet_multihead(x_small, packed_params)
    outs = [jax.block_until_ready(o) for o in outs]
    refs = reference(x_small, raw_params)
    for o, r in zip(outs, refs):
        assert o.shape == r.shape
        assert jnp.allclose(o, r, atol=ATOL, rtol=RTOL)

    # larger batch exercising the batch grid (2 x 256-row blocks, "parallel" axis)
    x_big = jax.random.normal(k_x, (512, INPUT_SIZE), dtype=jnp.float32)
    outs_big = fcnet_multihead(x_big, packed_params)
    outs_big = [jax.block_until_ready(o) for o in outs_big]
    refs_big = reference(x_big, raw_params)
    for o, r in zip(outs_big, refs_big):
        assert o.shape == r.shape
        assert jnp.allclose(o, r, atol=ATOL, rtol=RTOL)

    print("KERNEL_OK")
</pallas_src>

<mosaic_0001>
module attributes {stable_mosaic.version = 11 : i64} {
  func.func @fcnet_multihead_kernel(%arg0: i32, %arg1: memref<8x16xf32, #tpu.memory_space<vmem>>, %arg2: memref<16x32xbf16, #tpu.memory_space<vmem>>, %arg3: memref<32x32xbf16, #tpu.memory_space<vmem>>, %arg4: memref<32x32xbf16, #tpu.memory_space<vmem>>, %arg5: memref<32x8xbf16, #tpu.memory_space<vmem>>, %arg6: memref<4x32xf32, #tpu.memory_space<vmem>>, %arg7: memref<8x8xf32, #tpu.memory_space<vmem>>) attributes {dimension_semantics = [#tpu.dimension_semantics<parallel>], iteration_bounds = array<i64: 1>, scalar_prefetch = 0 : i64, scratch_operands = 0 : i64, tpu.core_type = #tpu.core_type<tc>, window_params = [{transform_indices = @transform_0, window_bounds = array<i64: 8, 16>}, {pipeline_mode = #tpu.pipeline_mode<synchronous>, transform_indices = @transform_1, window_bounds = array<i64: 16, 32>}, {pipeline_mode = #tpu.pipeline_mode<synchronous>, transform_indices = @transform_2, window_bounds = array<i64: 32, 32>}, {pipeline_mode = #tpu.pipeline_mode<synchronous>, transform_indices = @transform_3, window_bounds = array<i64: 32, 32>}, {pipeline_mode = #tpu.pipeline_mode<synchronous>, transform_indices = @transform_4, window_bounds = array<i64: 32, 8>}, {pipeline_mode = #tpu.pipeline_mode<synchronous>, transform_indices = @transform_5, window_bounds = array<i64: 4, 32>}, {transform_indices = @transform_6, window_bounds = array<i64: 8, 8>}]} {
    %c0 = arith.constant 0 : index
    %c0_0 = arith.constant 0 : index
    %0 = vector.load %arg1[%c0, %c0_0] : memref<8x16xf32, #tpu.memory_space<vmem>>, vector<8x16xf32>
    %1 = arith.truncf %0 : vector<8x16xf32> to vector<8x16xbf16>
    %c0_1 = arith.constant 0 : index
    %c0_2 = arith.constant 0 : index
    %2 = vector.load %arg2[%c0_1, %c0_2] : memref<16x32xbf16, #tpu.memory_space<vmem>>, vector<16x32xbf16>
    %cst = arith.constant dense<0.000000e+00> : vector<8x32xf32>
    %3 = tpu.matmul %1, %2, %cst {dimension_numbers = #tpu.dot_dimension_numbers<[1], [0], [0], [1], [0, 0, 1, 1], [], []>} : vector<8x16xbf16>, vector<16x32xbf16>, vector<8x32xf32> -> vector<8x32xf32>
    %c0_3 = arith.constant 0 : index
    %c0_4 = arith.constant 0 : index
    %4 = vector.load %arg6[%c0_3, %c0_4] : memref<4x32xf32, #tpu.memory_space<vmem>>, vector<1x32xf32>
    %5 = vector.broadcast %4 : vector<1x32xf32> to vector<8x32xf32>
    %6 = arith.addf %3, %5 : vector<8x32xf32>
    %cst_5 = arith.constant 0.000000e+00 : f32
    %7 = vector.broadcast %cst_5 : f32 to vector<8x32xf32>
    %8 = arith.maximumf %6, %7 : vector<8x32xf32>
    %9 = arith.truncf %8 : vector<8x32xf32> to vector<8x32xbf16>
    %c0_6 = arith.constant 0 : index
    %c0_7 = arith.constant 0 : index
    %10 = vector.load %arg3[%c0_6, %c0_7] : memref<32x32xbf16, #tpu.memory_space<vmem>>, vector<32x32xbf16>
    %cst_8 = arith.constant dense<0.000000e+00> : vector<8x32xf32>
    %11 = tpu.matmul %9, %10, %cst_8 {dimension_numbers = #tpu.dot_dimension_numbers<[1], [0], [0], [1], [0, 0, 1, 1], [], []>} : vector<8x32xbf16>, vector<32x32xbf16>, vector<8x32xf32> -> vector<8x32xf32>
    %c1 = arith.constant 1 : index
    %c0_9 = arith.constant 0 : index
    %12 = vector.load %arg6[%c1, %c0_9] : memref<4x32xf32, #tpu.memory_space<vmem>>, vector<1x32xf32>
    %13 = vector.broadcast %12 : vector<1x32xf32> to vector<8x32xf32>
    %14 = arith.addf %11, %13 : vector<8x32xf32>
    %cst_10 = arith.constant 0.000000e+00 : f32
    %15 = vector.broadcast %cst_10 : f32 to vector<8x32xf32>
    %16 = arith.maximumf %14, %15 : vector<8x32xf32>
    %17 = arith.truncf %16 : vector<8x32xf32> to vector<8x32xbf16>
    %c0_11 = arith.constant 0 : index
    %c0_12 = arith.constant 0 : index
    %18 = vector.load %arg4[%c0_11, %c0_12] : memref<32x32xbf16, #tpu.memory_space<vmem>>, vector<32x32xbf16>
    %cst_13 = arith.constant dense<0.000000e+00> : vector<8x32xf32>
    %19 = tpu.matmul %17, %18, %cst_13 {dimension_numbers = #tpu.dot_dimension_numbers<[1], [0], [0], [1], [0, 0, 1, 1], [], []>} : vector<8x32xbf16>, vector<32x32xbf16>, vector<8x32xf32> -> vector<8x32xf32>
    %c2 = arith.constant 2 : index
    %c0_14 = arith.constant 0 : index
    %20 = vector.load %arg6[%c2, %c0_14] : memref<4x32xf32, #tpu.memory_space<vmem>>, vector<1x32xf32>
    %21 = vector.broadcast %20 : vector<1x32xf32> to vector<8x32xf32>
    %22 = arith.addf %19, %21 : vector<8x32xf32>
    %cst_15 = arith.constant 0.000000e+00 : f32
    %23 = vector.broadcast %cst_15 : f32 to vector<8x32xf32>
    %24 = arith.maximumf %22, %23 : vector<8x32xf32>
    %25 = arith.truncf %24 : vector<8x32xf32> to vector<8x32xbf16>
    %c0_16 = arith.constant 0 : index
    %c0_17 = arith.constant 0 : index
    %26 = vector.load %arg5[%c0_16, %c0_17] : memref<32x8xbf16, #tpu.memory_space<vmem>>, vector<32x8xbf16>
    %cst_18 = arith.constant dense<0.000000e+00> : vector<8x8xf32>
    %27 = tpu.matmul %25, %26, %cst_18 {dimension_numbers = #tpu.dot_dimension_numbers<[1], [0], [0], [1], [0, 0, 1, 1], [], []>} : vector<8x32xbf16>, vector<32x8xbf16>, vector<8x8xf32> -> vector<8x8xf32>
    %c3 = arith.constant 3 : index
    %c0_19 = arith.constant 0 : index
    %28 = vector.load %arg6[%c3, %c0_19] : memref<4x32xf32, #tpu.memory_space<vmem>>, vector<1x8xf32>
    %29 = vector.broadcast %28 : vector<1x8xf32> to vector<8x8xf32>
    %30 = arith.addf %27, %29 : vector<8x8xf32>
    %c0_20 = arith.constant 0 : index
    %c0_21 = arith.constant 0 : index
    %31 = vector.load %arg7[%c0_20, %c0_21] : memref<8x8xf32, #tpu.memory_space<vmem>>, vector<8x8xf32>
    tpu.vector_store %arg7[%c0_20, %c0_21], %30 {strides = array<i32>} : memref<8x8xf32, #tpu.memory_space<vmem>>, vector<8x8xf32>,
    return
  }
  func.func @transform_0(%arg0: i32) -> (i32, i32) {
    %c0_i32 = arith.constant 0 : i32
    %c0_i32_0 = arith.constant 0 : i32
    return %arg0, %c0_i32 : i32, i32
  }
  func.func @transform_1(%arg0: i32) -> (i32, i32) {
    %c0_i32 = arith.constant 0 : i32
    %c0_i32_0 = arith.constant 0 : i32
    %c0_i32_1 = arith.constant 0 : i32
    return %c0_i32, %c0_i32_0 : i32, i32
  }
  func.func @transform_2(%arg0: i32) -> (i32, i32) {
    %c0_i32 = arith.constant 0 : i32
    %c0_i32_0 = arith.constant 0 : i32
    %c0_i32_1 = arith.constant 0 : i32
    return %c0_i32, %c0_i32_0 : i32, i32
  }
  func.func @transform_3(%arg0: i32) -> (i32, i32) {
    %c0_i32 = arith.constant 0 : i32
    %c0_i32_0 = arith.constant 0 : i32
    %c0_i32_1 = arith.constant 0 : i32
    return %c0_i32, %c0_i32_0 : i32, i32
  }
  func.func @transform_4(%arg0: i32) -> (i32, i32) {
    %c0_i32 = arith.constant 0 : i32
    %c0_i32_0 = arith.constant 0 : i32
    %c0_i32_1 = arith.constant 0 : i32
    return %c0_i32, %c0_i32_0 : i32, i32
  }
  func.func @transform_5(%arg0: i32) -> (i32, i32) {
    %c0_i32 = arith.constant 0 : i32
    %c0_i32_0 = arith.constant 0 : i32
    %c0_i32_1 = arith.constant 0 : i32
    return %c0_i32, %c0_i32_0 : i32, i32
  }
  func.func @transform_6(%arg0: i32) -> (i32, i32) {
    %c0_i32 = arith.constant 0 : i32
    %c0_i32_0 = arith.constant 0 : i32
    return %arg0, %c0_i32 : i32, i32
  }
}

</mosaic_0001>

<bundles_post_ra>
// kernel: tpu_custom_call.1
= control target key start
LH: loop header
LB: loop body
LE: loop exit
PB: predicated region body
PF: predicated region fallthrough
CT: control target
= control target key end

     0   :  { %11 = vsyncpa [#allocation3], 0  ;;  %s459_s0 = inlined_call_operand.hbm [shape: f32[8,16], index: 0, kind: input, shape index: {}]   ;;  %s460_s1 = inlined_call_operand.hbm [shape: bf16[16,32], index: 1, kind: input, shape index: {}]   ;;  %s461_s2 = inlined_call_operand.vmem [shape: bf16[32,32], index: 2, kind: input, shape index: {}]   ;;  %s462_s3 = inlined_call_operand.hbm [shape: bf16[32,32], index: 3, kind: input, shape index: {}]   ;;  %s463_s4 = inlined_call_operand.vmem [shape: bf16[32,8], index: 4, kind: input, shape index: {}]   ;;  %s464_s5 = inlined_call_operand.vmem [shape: f32[4,32], index: 5, kind: input, shape index: {}]   ;;  %s465_s6 = inlined_call_operand.hbm [shape: f32[8,8], index: 6, kind: output, shape index: {}]  }
   0x1   :  { %12 = vsyncpa [#allocation6], 0  ;;  %s29_s23 = sshll.u32 %s460_s1, 4  ;;  %s30_s23 = int_to_ptr.hbm [resolvable:$true] %s29_s23 }
   0x2   :  { %13 = vsyncpa [#allocation4], 0  ;;  %s379_s24 = smov [#allocation5]   ;;  %s19_s28 = sshll.u32 %s459_s0, 4  ;;  %s20_s28 = int_to_ptr.hbm [resolvable:$true] %s19_s28 }
   0x3   :  { %s31_s25 = sshll.u32 %s379_s24, 4  ;;  %s380_s29 = smov 64   ;;  %s32_s25 = int_to_ptr.vmem [resolvable:$true] %s31_s25 }
   0x4   :  { %s381_s30 = smov 4   ;;  %s382_s7 = smov [#allocation2]  }
   0x5   :  { %37 = dma.hbm_to_vmem [thread:$0]  %s30_s23, 128, %s32_s25, [#allocation6], %s380_s29, %s380_s29, %s381_s30  }
   0x6   :  { %s21_s8 = sshll.u32 %s382_s7, 4  ;;  %s44_s11 = sshll.u32 %s462_s3, 4  ;;  %s22_s8 = int_to_ptr.vmem [resolvable:$true] %s21_s8  ;;  %s45_s11 = int_to_ptr.hbm [resolvable:$true] %s44_s11 }
   0x7   :  { %24 = dma.hbm_to_vmem [thread:$0]  %s20_s28, 128, %s22_s8, [#allocation3]  }
   0x8   :  { %s383_s1 = smov [#allocation7]  }
   0x9   :  { %s46_s12 = sshll.u32 %s383_s1, 4  ;;  %s47_s12 = int_to_ptr.vmem [resolvable:$true] %s46_s12 }
   0xa   :  { %52 = dma.hbm_to_vmem [thread:$0]  %s45_s11, 256, %s47_s12, [#allocation6], %s380_s29, %s380_s29, %s381_s30  }
   0xb   :  { %373 = dma.done.wait [#allocation3], 128  }
   0xc   :  { %374 = vsyncadd [#allocation3], 4294967168 }
   0xd   :  { %375 = dma.done.wait [#allocation6], 384  }
   0xe   :  { %376 = vsyncadd [#allocation6], 4294966912  ;;  %v260_v0 = vld [vmem:[#allocation5] sm:$0xff]  ;;  %v70_v1 = vld [vmem:[#allocation2] sm:$0xff]  ;;  %vm82_vm0 = vcmask 130048   ;;  %vm119_vm1 = vcmask 261120  }
   0xf   :  { %v71_v2 = vpack.c.bf16 %v70_v1, %v70_v1  ;;  %93 = vmatpush.bf16.msra.mxu0 %v260_v0  ;;  %v262_v3 = vld [vmem:[%s461_s2 + $0x8] sm:$0xff]  ;;  %v261_v4 = vld [vmem:[%s461_s2] sm:$0xff]  ;;  %v264_v11 = vld [vmem:[#allocation7 + $0x8] sm:$0xff]  ;;  %s384_s26 = smov [#allocation8]   ;;  %s217_s29 = sshll.u32 %s465_s6, 4  ;;  %vm208_vm2 = vcmask 64512   ;;  %s218_s29 = int_to_ptr.hbm [resolvable:$true] %s217_s29 }
  0x10   :  { %129 = vmatpush.bf16.msra.mxu1 %v262_v3  ;;  %v273_v5 = vld [vmem:[%s464_s5] ss:$0 sm:$0xff]  ;;  %165 = vmatpush.bf16.msra.mxu2 %v264_v11  ;;  %v263_v12 = vld [vmem:[#allocation7] sm:$0xff]  ;;  %v274_v13 = vld [vmem:[%s464_s5 + $0x1] ss:$0 sm:$0xff]  ;;  %s215_s27 = sshll.u32 %s384_s26, 4  ;;  %s216_s27 = int_to_ptr.vmem [resolvable:$true] %s215_s27 }
  0x11   :  { %v266_v19 = vld [vmem:[%s463_s4 + $0x8] sm:$0xff]  ;;  %v265_v20 = vld [vmem:[%s463_s4] sm:$0xff] }
  0x12   :  { %232 = vmatmul.msk.bf16.vlgmr.msra.gmra.mxu0 %vm82_vm0, %v71_v2  ;;  %201 = vmatpush.bf16.msra.mxu3 %v266_v19  ;;  %v275_v21 = vld [vmem:[%s464_s5 + $0x2] ss:$0 sm:$0xff]  ;;  %v276_v27 = vld [vmem:[%s464_s5 + $0x3] ss:$0 sm:$0xff] }
  0x14   :  { %130 = vmatpush.bf16.msra.mxu1 %v261_v4  ;;  %166 = vmatpush.bf16.msra.mxu2 %v263_v12 }
  0x16   :  { %202 = vmatpush.bf16.msra.mxu3 %v265_v20 }
  0x8f   :  { %v95_v6 = vpop.f32.mrf.mxu0 }
  0x90   :  { %v96_v7 = vadd.f32 %v273_v5, %v95_v6 }
  0x92   :  { %v99_v8 = vmax.f32 %v96_v7, 0.0 }
  0x94   :  { %v100_v9 = vpack.c.bf16 %v99_v8, %v99_v8 }
  0x96   :  { %241 = vmatmul.msk.bf16.vlgmr.msra.gmra.mxu1 %vm119_vm1, %v100_v9 }
  0x97   :  { %v97_v10 = vpop.f32.mrf.mxu0 }
 0x113   :  { %v132_v14 = vpop.f32.mrf.mxu1 }
 0x114   :  { %v133_v15 = vadd.f32 %v274_v13, %v132_v14 }
 0x116   :  { %v136_v16 = vmax.f32 %v133_v15, 0.0 }
 0x118   :  { %v137_v17 = vpack.c.bf16 %v136_v16, %v136_v16 }
 0x11a   :  { %250 = vmatmul.msk.bf16.vlgmr.msra.gmra.mxu2 %vm119_vm1, %v137_v17 }
 0x11b   :  { %v134_v18 = vpop.f32.mrf.mxu1 }
 0x19d   :  { %v168_v22 = vpop.f32.mrf.mxu2 }
 0x19e   :  { %v169_v23 = vadd.f32 %v275_v21, %v168_v22 }
 0x1a0   :  { %v172_v24 = vmax.f32 %v169_v23, 0.0 }
 0x1a2   :  { %v173_v25 = vpack.c.bf16 %v172_v24, %v172_v24 }
 0x1a4   :  { %259 = vmatmul.msk.bf16.vlgmr.msra.gmra.mxu3 %vm119_vm1, %v173_v25 }
 0x1a5   :  { %v170_v26 = vpop.f32.mrf.mxu2 }
 0x227   :  { %v204_v28 = vpop.f32.mrf.mxu3 }
 0x228   :  { %v205_v29 = vadd.f32 %v276_v27, %v204_v28 }
 0x22a   :  { %209 = vst.msk [vmem:[#allocation8] sm:$0xff] %vm208_vm2, %v205_v29 }
 0x22b   :  { %220 = dma.vmem_to_hbm [thread:$0]  %s216_s27, 128, %s218_s29, [#allocation4]  }
 0x22f   :  { %v206_v30 = vpop.f32.mrf.mxu3 }
 0x230   :  { %377 = dma.done.wait [#allocation4], 128  }
 0x231   :  { %378 = vsyncadd [#allocation4], 4294967168 }
 0x232   :  { %225 = vsyncpa [#allocation3], 1 }
 0x233   :  { %226 = vsyncpa [#allocation6], 1 }
 0x234   :  { %227 = vsyncpa [#allocation4], 1 }

</bundles_post_ra>
